<compile_context>
chip_gen: v6e
topology: v6e:2x2x1
jax: 0.10.0
libtpu: 0.0.40
codegen_flags: <defaults>
</compile_context>

<pallas_src>
import functools
import math

import jax
import jax.numpy as jnp
from jax.experimental import pallas as pl
from jax.experimental.pallas import tpu as pltpu


def _mhsa_kernel(x_ref, wqkv_ref, wo_ref, o_ref, acc_ref, *,
                 head_dim, look_ahead_mask):
    h = pl.program_id(1)
    num_heads = pl.num_programs(1)

    @pl.when(h == 0)
    def _():
        acc_ref[...] = jnp.zeros_like(acc_ref)

    x = x_ref[0]                        # (S, E)   compute dtype (f32 or bf16)
    wqkv = wqkv_ref[0]                  # (E, 3*Dh) -- Q columns pre-scaled by 1/sqrt(Dh)
    wo_h = wo_ref[0]                    # (Dh, E)   -- this head's rows of W_O^T

    Dh = head_dim
    # Fused Q/K/V projection: one matmul per head (was 3).
    qkv = jnp.dot(x, wqkv, preferred_element_type=jnp.float32)     # (S, 3*Dh) f32
    q = qkv[:, :Dh]
    k = qkv[:, Dh:2 * Dh]
    v = qkv[:, 2 * Dh:]

    # Scores: contract the Dh axis of both operands directly (no k.T transpose).
    score = jax.lax.dot_general(
        q, k, dimension_numbers=(((1,), (1,)), ((), ())),
        preferred_element_type=jnp.float32)                        # (S, S) f32

    if look_ahead_mask:
        S = score.shape[0]
        row = jax.lax.broadcasted_iota(jnp.int32, (S, S), 0)
        col = jax.lax.broadcasted_iota(jnp.int32, (S, S), 1)
        # PyTorch module *assigns* -1e9 (replace, not add).
        score = jnp.where(col > row, jnp.float32(-1e9), score)

    # Numerically stable softmax in f32; reciprocal on the EUP slot.
    score = score - jnp.max(score, axis=-1, keepdims=True)
    e = jnp.exp(score)
    attn = e * pl.reciprocal(jnp.sum(e, axis=-1, keepdims=True), approx=True)

    # Attention-weighted values, then accumulate this head's contribution to the
    # output projection (no concat of head outputs).
    cdt = x.dtype
    head_out = jnp.dot(attn.astype(cdt), v.astype(cdt),
                       preferred_element_type=jnp.float32)         # (S, Dh) f32
    acc_ref[...] += jnp.dot(head_out.astype(cdt), wo_h,
                            preferred_element_type=jnp.float32)    # (S, E)  f32

    @pl.when(h == num_heads - 1)
    def _():
        o_ref[0] = acc_ref[...].astype(o_ref.dtype)


def mutil_head_self_attention(x, wq, wk, wv, wo_t, *, look_ahead_mask=False,
                              compute_dtype=jnp.float32):
    """x: (B, S, E); wq/wk/wv: (H, E, Dh); wo_t: (E, E). Returns (B, S, E) f32."""
    B, S, E = x.shape
    H, _, Dh = wq.shape
    assert H * Dh == E

    # Fuse per-head Q/K/V weights into (H, E, 3*Dh); fold 1/sqrt(Dh) into Q cols.
    scale = 1.0 / math.sqrt(Dh)
    w_qkv = jnp.concatenate([wq * scale, wk, wv], axis=-1)          # (H, E, 3*Dh)
    wo_heads = wo_t.reshape(H, Dh, E)                               # per-head rows of W_O^T

    x_c = x.astype(compute_dtype)
    w_qkv = w_qkv.astype(compute_dtype)
    wo_heads = wo_heads.astype(compute_dtype)

    kernel = functools.partial(_mhsa_kernel, head_dim=Dh,
                               look_ahead_mask=look_ahead_mask)

    return pl.pallas_call(
        kernel,
        out_shape=jax.ShapeDtypeStruct((B, S, E), jnp.float32),
        grid_spec=pltpu.PrefetchScalarGridSpec(
            num_scalar_prefetch=0,
            # Heads innermost: reduction axis for the output-projection
            # accumulation (output block index is invariant in h).
            grid=(B, H),
            in_specs=[
                pl.BlockSpec((1, S, E), lambda b, h: (b, 0, 0)),        # x (per batch, reused across h)
                pl.BlockSpec((1, E, 3 * Dh), lambda b, h: (h, 0, 0)),   # fused W_qkv (per head)
                pl.BlockSpec((1, Dh, E), lambda b, h: (h, 0, 0)),       # W_O^T slice (per head)
            ],
            out_specs=pl.BlockSpec((1, S, E), lambda b, h: (b, 0, 0)),
            scratch_shapes=[pltpu.VMEM((S, E), jnp.float32)],           # output-proj accumulator
        ),
        compiler_params=pltpu.CompilerParams(
            dimension_semantics=("parallel", "arbitrary")),
    )(x_c, w_qkv, wo_heads)


def _reference(x, wq, wk, wv, wo_t, look_ahead_mask=False):
    """Pure-JAX f32 reference replicating the PyTorch forward (unfused)."""
    H, E, Dh = wq.shape
    S = x.shape[1]
    outs = []
    for h in range(H):
        q = x @ wq[h]
        k = x @ wk[h]
        v = x @ wv[h]
        score = q @ jnp.swapaxes(k, -1, -2) / math.sqrt(Dh)
        if look_ahead_mask:
            row = jnp.arange(S)[:, None]
            col = jnp.arange(S)[None, :]
            score = jnp.where(col > row, -1e9, score)
        score = jax.nn.softmax(score, axis=-1)
        outs.append(score @ v)
    concat = jnp.concatenate(outs, axis=-1)
    return concat @ wo_t


if __name__ == "__main__":
    # Small shapes consistent with the module: embedding_nums=32, head_nums=4,
    # head_embedding_nums=8, batch=2, seq=8.
    B, S, E, H = 2, 8, 32, 4
    Dh = E // H

    key = jax.random.PRNGKey(0)
    kx, kq, kk, kv, ko = jax.random.split(key, 5)

    x = jax.random.normal(kx, (B, S, E), dtype=jnp.float32)

    # Deterministic "nn.Linear(bias=False)"-style init: uniform(-1/sqrt(in), 1/sqrt(in)).
    bnd = 1.0 / math.sqrt(E)
    wq = jax.random.uniform(kq, (H, E, Dh), minval=-bnd, maxval=bnd, dtype=jnp.float32)
    wk = jax.random.uniform(kk, (H, E, Dh), minval=-bnd, maxval=bnd, dtype=jnp.float32)
    wv = jax.random.uniform(kv, (H, E, Dh), minval=-bnd, maxval=bnd, dtype=jnp.float32)
    wo_t = jax.random.uniform(ko, (E, E), minval=-bnd, maxval=bnd, dtype=jnp.float32)

    # f32 compute, no mask.
    out = mutil_head_self_attention(x, wq, wk, wv, wo_t, look_ahead_mask=False)
    out = jax.block_until_ready(out)
    ref = _reference(x, wq, wk, wv, wo_t, look_ahead_mask=False)
    assert out.shape == (B, S, E)
    # Tolerance accounts for the approximate (EUP) reciprocal in the softmax.
    assert jnp.allclose(out, ref, atol=1e-2, rtol=1e-2), "f32/no-mask mismatch"

    # f32 compute, causal mask.
    out_m = mutil_head_self_attention(x, wq, wk, wv, wo_t, look_ahead_mask=True)
    out_m = jax.block_until_ready(out_m)
    ref_m = _reference(x, wq, wk, wv, wo_t, look_ahead_mask=True)
    assert jnp.allclose(out_m, ref_m, atol=1e-2, rtol=1e-2), "f32/mask mismatch"

    # bf16 matmul operands (f32 accumulation + f32 softmax), causal mask.
    out_b = mutil_head_self_attention(x, wq, wk, wv, wo_t, look_ahead_mask=True,
                                      compute_dtype=jnp.bfloat16)
    out_b = jax.block_until_ready(out_b)
    assert jnp.allclose(out_b, ref_m, atol=5e-2, rtol=5e-2), "bf16/mask mismatch"

    print("KERNEL_OK")
</pallas_src>

<mosaic_0001>
module attributes {stable_mosaic.version = 11 : i64} {
  func.func @_mhsa_kernel(%arg0: i32, %arg1: i32, %arg2: memref<1x8x32xf32, #tpu.memory_space<vmem>>, %arg3: memref<1x32x24xf32, #tpu.memory_space<vmem>>, %arg4: memref<1x8x32xf32, #tpu.memory_space<vmem>>, %arg5: memref<1x8x32xf32, #tpu.memory_space<vmem>>, %arg6: memref<8x32xf32, #tpu.memory_space<vmem>>) attributes {dimension_semantics = [#tpu.dimension_semantics<parallel>, #tpu.dimension_semantics<arbitrary>], iteration_bounds = array<i64: 2, 4>, scalar_prefetch = 0 : i64, scratch_operands = 1 : i64, tpu.core_type = #tpu.core_type<tc>, window_params = [{transform_indices = @transform_0, window_bounds = array<i64: 1, 8, 32>}, {transform_indices = @transform_1, window_bounds = array<i64: 1, 32, 24>}, {transform_indices = @transform_2, window_bounds = array<i64: 1, 8, 32>}, {transform_indices = @transform_3, window_bounds = array<i64: 1, 8, 32>}]} {
    %c0_i32 = arith.constant 0 : i32
    %0 = arith.cmpi eq, %arg1, %c0_i32 : i32
    %1 = arith.extui %0 : i1 to i32
    %c0_i32_0 = arith.constant 0 : i32
    %2 = arith.cmpi ne, %1, %c0_i32_0 : i32
    scf.if %2 {
      %cst_19 = arith.constant 0.000000e+00 : f32
      %32 = vector.broadcast %cst_19 : f32 to vector<8x32xf32>
      %c0_20 = arith.constant 0 : index
      %c0_21 = arith.constant 0 : index
      %33 = vector.load %arg6[%c0_20, %c0_21] : memref<8x32xf32, #tpu.memory_space<vmem>>, vector<8x32xf32>
      tpu.vector_store %arg6[%c0_20, %c0_21], %32 {strides = array<i32>} : memref<8x32xf32, #tpu.memory_space<vmem>>, vector<8x32xf32>,
    } else {
    }
    %c0 = arith.constant 0 : index
    %c0_1 = arith.constant 0 : index
    %c0_2 = arith.constant 0 : index
    %3 = vector.load %arg2[%c0, %c0_1, %c0_2] : memref<1x8x32xf32, #tpu.memory_space<vmem>>, vector<1x8x32xf32>
    %4 = vector.shape_cast %3 : vector<1x8x32xf32> to vector<8x32xf32>
    %c0_3 = arith.constant 0 : index
    %c0_4 = arith.constant 0 : index
    %c0_5 = arith.constant 0 : index
    %5 = vector.load %arg3[%c0_3, %c0_4, %c0_5] : memref<1x32x24xf32, #tpu.memory_space<vmem>>, vector<1x32x24xf32>
    %6 = vector.shape_cast %5 : vector<1x32x24xf32> to vector<32x24xf32>
    %c0_6 = arith.constant 0 : index
    %c0_7 = arith.constant 0 : index
    %c0_8 = arith.constant 0 : index
    %7 = vector.load %arg4[%c0_6, %c0_7, %c0_8] : memref<1x8x32xf32, #tpu.memory_space<vmem>>, vector<1x8x32xf32>
    %8 = vector.shape_cast %7 : vector<1x8x32xf32> to vector<8x32xf32>
    %cst = arith.constant dense<0.000000e+00> : vector<8x24xf32>
    %9 = tpu.matmul %4, %6, %cst {dimension_numbers = #tpu.dot_dimension_numbers<[1], [0], [0], [1], [0, 0, 1, 1], [], []>} : vector<8x32xf32>, vector<32x24xf32>, vector<8x24xf32> -> vector<8x24xf32>
    %10 = vector.extract_strided_slice %9 {offsets = [0, 0], sizes = [8, 8], strides = [1, 1]} : vector<8x24xf32> to vector<8x8xf32>
    %11 = vector.extract_strided_slice %9 {offsets = [0, 8], sizes = [8, 8], strides = [1, 1]} : vector<8x24xf32> to vector<8x8xf32>
    %12 = vector.extract_strided_slice %9 {offsets = [0, 16], sizes = [8, 8], strides = [1, 1]} : vector<8x24xf32> to vector<8x8xf32>
    %cst_9 = arith.constant dense<0.000000e+00> : vector<8x8xf32>
    %13 = tpu.matmul %10, %11, %cst_9 {dimension_numbers = #tpu.dot_dimension_numbers<[1], [1], [0], [0], [0, 0, 1, 0], [], []>} : vector<8x8xf32>, vector<8x8xf32>, vector<8x8xf32> -> vector<8x8xf32>
    %cst_10 = arith.constant dense<0xFF800000> : vector<8xf32>
    %14 = vector.multi_reduction <maximumf>, %13, %cst_10 [1] : vector<8x8xf32> to vector<8xf32>
    %15 = vector.shape_cast %14 : vector<8xf32> to vector<8x1xf32>
    %16 = vector.broadcast %15 : vector<8x1xf32> to vector<8x8xf32>
    %17 = arith.subf %13, %16 : vector<8x8xf32>
    %18 = math.exp %17 : vector<8x8xf32>
    %cst_11 = arith.constant dense<0.000000e+00> : vector<8xf32>
    %19 = vector.multi_reduction <add>, %18, %cst_11 [1] : vector<8x8xf32> to vector<8xf32>
    %20 = vector.shape_cast %19 : vector<8xf32> to vector<8x1xf32>
    %21 = tpu.reciprocal %20 {approx = true} : vector<8x1xf32> -> vector<8x1xf32>
    %22 = vector.broadcast %21 : vector<8x1xf32> to vector<8x8xf32>
    %23 = arith.mulf %18, %22 : vector<8x8xf32>
    %cst_12 = arith.constant dense<0.000000e+00> : vector<8x8xf32>
    %24 = tpu.matmul %23, %12, %cst_12 {dimension_numbers = #tpu.dot_dimension_numbers<[1], [0], [0], [1], [0, 0, 1, 1], [], []>} : vector<8x8xf32>, vector<8x8xf32>, vector<8x8xf32> -> vector<8x8xf32>
    %c0_13 = arith.constant 0 : index
    %c0_14 = arith.constant 0 : index
    %25 = vector.load %arg6[%c0_13, %c0_14] : memref<8x32xf32, #tpu.memory_space<vmem>>, vector<8x32xf32>
    %cst_15 = arith.constant dense<0.000000e+00> : vector<8x32xf32>
    %26 = tpu.matmul %24, %8, %cst_15 {dimension_numbers = #tpu.dot_dimension_numbers<[1], [0], [0], [1], [0, 0, 1, 1], [], []>} : vector<8x8xf32>, vector<8x32xf32>, vector<8x32xf32> -> vector<8x32xf32>
    %27 = arith.addf %25, %26 : vector<8x32xf32>
    %c0_16 = arith.constant 0 : index
    %c0_17 = arith.constant 0 : index
    %28 = vector.load %arg6[%c0_16, %c0_17] : memref<8x32xf32, #tpu.memory_space<vmem>>, vector<8x32xf32>
    tpu.vector_store %arg6[%c0_16, %c0_17], %27 {strides = array<i32>} : memref<8x32xf32, #tpu.memory_space<vmem>>, vector<8x32xf32>,
    %c3_i32 = arith.constant 3 : i32
    %29 = arith.cmpi eq, %arg1, %c3_i32 : i32
    %30 = arith.extui %29 : i1 to i32
    %c0_i32_18 = arith.constant 0 : i32
    %31 = arith.cmpi ne, %30, %c0_i32_18 : i32
    scf.if %31 {
      %c0_19 = arith.constant 0 : index
      %c0_20 = arith.constant 0 : index
      %32 = vector.load %arg6[%c0_19, %c0_20] : memref<8x32xf32, #tpu.memory_space<vmem>>, vector<8x32xf32>
      %c0_21 = arith.constant 0 : index
      %c0_22 = arith.constant 0 : index
      %c0_23 = arith.constant 0 : index
      %33 = vector.load %arg5[%c0_21, %c0_22, %c0_23] : memref<1x8x32xf32, #tpu.memory_space<vmem>>, vector<1x8x32xf32>
      %34 = vector.shape_cast %33 : vector<1x8x32xf32> to vector<8x32xf32>
      %35 = vector.shape_cast %32 : vector<8x32xf32> to vector<1x8x32xf32>
      tpu.vector_store %arg5[%c0_21, %c0_22, %c0_23], %35 {strides = array<i32>} : memref<1x8x32xf32, #tpu.memory_space<vmem>>, vector<1x8x32xf32>,
    } else {
    }
    return
  }
  func.func @transform_0(%arg0: i32, %arg1: i32) -> (i32, i32, i32) {
    %c0_i32 = arith.constant 0 : i32
    %c0_i32_0 = arith.constant 0 : i32
    %c0_i32_1 = arith.constant 0 : i32
    return %arg0, %c0_i32, %c0_i32_0 : i32, i32, i32
  }
  func.func @transform_1(%arg0: i32, %arg1: i32) -> (i32, i32, i32) {
    %c0_i32 = arith.constant 0 : i32
    %c0_i32_0 = arith.constant 0 : i32
    %c0_i32_1 = arith.constant 0 : i32
    return %arg1, %c0_i32, %c0_i32_0 : i32, i32, i32
  }
  func.func @transform_2(%arg0: i32, %arg1: i32) -> (i32, i32, i32) {
    %c0_i32 = arith.constant 0 : i32
    %c0_i32_0 = arith.constant 0 : i32
    %c0_i32_1 = arith.constant 0 : i32
    return %arg1, %c0_i32, %c0_i32_0 : i32, i32, i32
  }
  func.func @transform_3(%arg0: i32, %arg1: i32) -> (i32, i32, i32) {
    %c0_i32 = arith.constant 0 : i32
    %c0_i32_0 = arith.constant 0 : i32
    %c0_i32_1 = arith.constant 0 : i32
    return %arg0, %c0_i32, %c0_i32_0 : i32, i32, i32
  }
}

</mosaic_0001>

<bundles_post_ra>
// kernel: tpu_custom_call.1
= control target key start
LH: loop header
LB: loop body
LE: loop exit
PB: predicated region body
PF: predicated region fallthrough
CT: control target
= control target key end

     0   :  { %8 = vsyncpa [#allocation4], 0  ;;  %s1071_s0 = inlined_call_operand.vmem [shape: f32[2,8,32], index: 0, kind: input, shape index: {}]   ;;  %s1072_s1 = inlined_call_operand.vmem [shape: f32[4,32,24], index: 1, kind: input, shape index: {}]   ;;  %s1073_s2 = inlined_call_operand.vmem [shape: f32[4,8,32], index: 2, kind: input, shape index: {}]   ;;  %s1074_s3 = inlined_call_operand.hbm [shape: f32[2,8,32], index: 3, kind: output, shape index: {}]  }
   0x1   :  { %10 = vsyncpa [#allocation4 + $0x1], 0  ;;  %s915_s12 = smov 0   ;;  %s917_s13 = smov 0  }
   0x2   :  { %s919_s14 = smov 0   ;;  %s921_s15 = smov 0  }
   0x3   :  { %s923_s16 = smov 0   ;;  %s925_s17 = smov 0  }
   0x4   :  { %s927_s18 = smov 0   ;;  %s929_s19 = smov 0  }
   0x5 LB: > { %s656_s20 = sadd.s32 4294967295, %s887_s19   ;;  %s657_s21 = sadd.s32 4294967294, %s887_s19   ;;  %s887_s19 = sphi %s929_s19, %s16_s19   ;;  %s883_s18 = sphi %s927_s18, %s1090_s18   ;;  %s879_s17 = sphi %s925_s17, %s1089_s17   ;;  %s875_s16 = sphi %s923_s16, %s1088_s16   ;;  %s871_s15 = sphi %s921_s15, %s1087_s15   ;;  %s867_s14 = sphi %s919_s14, %s1086_s14   ;;  %s863_s13 = sphi %s917_s13, %s1085_s13   ;;  %s859_s12 = sphi %s915_s12, %s1084_s12  }
   0x6   : > { %s25_s22 = sadd.s32 1, %s879_s17  ;;  %s28_s23 = sadd.s32 1, %s883_s18 }
   0x7   : > { %p26_p0 = scmp.ge.s32.totalorder %s25_s22, 4  ;;  %p123_p1 = scmp.ne.s32.totalorder %s867_s14, %s863_s13 }
   0x8   : > { %p124_p2 = scmp.eq.s32.totalorder %s656_s20, 7  ;;  %p129_p4 = scmp.ne.s32.totalorder %s863_s13, %s859_s12 }
   0x9   : > { %s1092_s22 = smov (%p26_p0, %s25_s22), 0  ;;  %s1094_s23 = smov (!%p26_p0, %s28_s23), %s883_s18 }
   0xa   : > { %1077 = sst [smem:[#allocation6_spill]] %s1092_s22  ;;  %p964_p3 = por %p124_p2, %p123_p1 }
   0xb   : > { %p30_p5 = scmp.ge.s32.totalorder %s1094_s23, 2  ;;  %p130_p6 = scmp.eq.s32.totalorder %s657_s21, 7 }
   0xc   : > { %p660_p7 = scmp.ge.s32.totalorder %s887_s19, 1  ;;  %p170_p8 = scmp.lt.s32.totalorder %s887_s19, 9 }
   0xd   : > { %s1096_s23 = smov (%p30_p5, %s1094_s23), 0  ;;  %p974_p9 = por %p130_p6, %p129_p4 }
   0xe   : > { %1079 = sst [smem:[#allocation7_spill]] %s1096_s23  ;;  %p171_p10 = pnand %p660_p7, %p170_p8 }
   0xf   : > { %s110_s26 = ssub.s32 %s883_s18, %s1096_s23  ;;  %s113_s27 = sadd.s32 1, %s867_s14 }
  0x10   : > { %p111_p11 = scmp.eq.s32.totalorder %s110_s26, 0  ;;  %174 = sbr.rel (%p171_p10) target bundleno = 1276 (0x4fc), region = 32 }
  0x11   : > { %s1076_s29 = sand.u32 (!%p171_p10), 1, %s863_s13   ;;  %p202_p12 = scmp.lt.s32.totalorder (!%p171_p10), %s875_s16, 1 }
  0x12   : > { %s982_s28 = scalar_select %p111_p11, %s867_s14, %s113_s27  }
  0x13   : > { %s988_s30 = sshll.u32 (!%p171_p10), %s1076_s29, 3  ;;  %p206_p13 = scmp.lt.s32.totalorder (!%p171_p10), %s871_s15, 3 }
  0x14   : > { %s201_s22 = scalar_lea.vmem (!%p171_p10), [#allocation3], %s988_s30  ;;  %p666_p0 = scmp.ne.s32.totalorder (!%p171_p10), %s871_s15, 0 }
  0x15   : > { %s203_s4 = scalar_select %p202_p12, %s875_s16, 1 }
  0x16   : > { %s207_s5 = scalar_select %p206_p13, %s871_s15, 3 }
  0x17   : > { %s662_s6 = sshll.u32 %s203_s4, 3  ;;  %218 = sbr.rel (%p666_p0) target bundleno = 30 (0x1e), region = 36 }
  0x18   : > { %s205_s9 = scalar_lea.vmem %s1071_s0, %s662_s6  ;;  %s677_s10 = sshll.u32 %s207_s5, 5 }
  0x19   : > { %s210_s21 = scalar_lea.vmem %s1072_s1, %s677_s10  ;;  %s665_s26 = sshll.u32 %s207_s5, 3 }
  0x1a   : > { %s1002_s29 = scalar_lea.vmem %s1073_s2, %s665_s26 }
  0x1c   : > { %vm219_vm0 = vcmask 261120   ;;  %v889_v0 = vmov 0.0  }
  0x1d   : > { %220 = vst.msk [vmem:[#allocation2] sm:$0xff] %vm219_vm0, %v889_v0 }
  0x1e PF: > { %v225_v1 = vld [vmem:[%s210_s21 + $0x18] sm:$0xff]  ;;  %v890_v2 = vmov 0.0   ;;  %v224_v3 = vld [vmem:[%s210_s21 + $0x10] sm:$0xff]  ;;  %vm891_vm1 = vmmov 0   ;;  %v223_v4 = vld [vmem:[%s210_s21 + $0x8] sm:$0xff]  ;;  %vm227_vm2 = vcmask 261120  }
  0x1f   : > { %689 = vmatprep.subr.mxu0 %v890_v2  ;;  %697 = vmatprep.mubr.msk.f32.mxu0 %vm891_vm1, %v890_v2  ;;  %v222_v5 = vld [vmem:[%s210_s21] sm:$0xff]  ;;  %s892_s23 = smov 120   ;;  %vm304_vm3 = vcmask 64512   ;;  %s893_s4 = smov 112  }
  0x20   : > { %690 = vmatpush3.msra.mxu0 %v225_v1  ;;  %700 = vmatprep.subr.mxu1 %v890_v2  ;;  %v221_v6 = vld [vmem:[%s205_s9] sm:$0xff]  ;;  %p672_p1 = scmp.ne.s32.totalorder %s871_s15, 3 }
  0x21   : > { %691 = vmatprep.subr.mxu0 %v890_v2  ;;  %702 = vmatprep.mubr.msk.f32.mxu1 %vm891_vm1, %v890_v2  ;;  %v226_v18 = vld [vmem:[%s1002_s29] sm:$0xff] }
  0x22   : > { %692 = vmatpush3.msra.mxu0 %v224_v3 }
  0x23   : > { %693 = vmatprep.subr.mxu0 %v890_v2 }
  0x24   : > { %694 = vmatpush3.msra.mxu0 %v223_v4  ;;  %v466_v25 = vld [vmem:[#allocation2] sm:$0xff] }
  0x25   : > { %695 = vmatprep.subr.mxu0 %v890_v2 }
  0x26   : > { %696 = vmatpush3.msra.mxu0 %v222_v5 }
  0x27   : > { %698 = vmatmul.mubr.msk.f32.vlgmr.msra.gmra.mxu0 %vm227_vm2, %v221_v6  ;;  %710 = vmatprep.subr.mxu0 %v890_v2 }
  0x28   : > { %712 = vmatprep.mubr.msk.f32.mxu0 %vm891_vm1, %v890_v2  ;;  %711 = vmatpush3.msra.mxu0 %v226_v18 }
  0xe7   : > { %v297_v7 = vpop.f32.mrf.mxu0 }
  0xe8   : > { %302 = vrot.lane.b32.xlu0 %v297_v7, %s892_s23 }
  0xe9   : > { %v699_v8 = vpop.f32.mrf.mxu0 }
 0x15a   : > { %v303_v9 = vpop.permute.xlu0 %302 }
 0x15b   : > { %701 = vmatpush3.xpose.msk.msra.mxu1 %vm304_vm3, %v303_v9 }
 0x15c   : > { %705 = vmatprep.subr.mxu1 %v890_v2 }
 0x15e   : > { %703 = vmatmul.mubr.msk.f32.vlgmr.msra.gmra.mxu1 %vm304_vm3, %v297_v7 }
 0x15f   : > { %707 = vmatprep.mubr.msk.f32.mxu1 %vm891_vm1, %v890_v2 }
 0x21e   : > { %v375_v10 = vpop.f32.mrf.mxu1 }
 0x21f   : > { %v379_v11 = vsel %vm304_vm3, %v375_v10, -inf }
 0x220   : > { %380 = vmax.xlane.f32.xlu0 %v379_v11  ;;  %v704_v12 = vpop.f32.mrf.mxu1 }
 0x2a9   : > { %v381_v13 = vpop.xlane.xlu0 %380 }
 0x2aa   : > { %v382_v14 = vsub.f32 %v375_v10, %v381_v13 }
 0x2ac   : > { %v383_v15 = vmul.f32 1.442695, %v382_v14 }
 0x2ae   : > { %791 = vpow2.f32 %v383_v15 }
 0x2bb   : > { %v792_v16 = vpop.eup %791 }
 0x2bc   : > { %v385_v17 = vsel %vm304_vm3, %v792_v16, 0.0 }
 0x2bd   : > { %386 = vadd.xlane.f32.xlu1 %v385_v17 }
 0x2ce   : > { %390 = vrot.lane.b32.xlu1 %v297_v7, %s893_s4 }
 0x346   : > { %v387_v19 = vpop.xlane.xlu1 %386 }
 0x347   : > { %793 = vrcp.f32 %v387_v19 }
 0x34a   : > { %v391_v20 = vpop.permute.xlu1 %390 }
 0x34b   : > { %706 = vmatpush3.msra.mxu1 %v391_v20 }
 0x354   : > { %v794_v21 = vpop.eup %793 }
 0x355   : > { %v389_v22 = vmul.f32 %v794_v21, %v792_v16 }
 0x357   : > { %708 = vmatmul.mubr.msk.f32.vlgmr.msra.gmra.mxu1 %vm304_vm3, %v389_v22 }
 0x417   : > { %v462_v23 = vpop.f32.mrf.mxu1 }
 0x418   : > { %713 = vmatmul.mubr.msk.f32.vlgmr.msra.gmra.mxu0 %vm304_vm3, %v462_v23 }
 0x419   : > { %v709_v24 = vpop.f32.mrf.mxu1 }
 0x4d7   : > { %545 = sbr.rel (%p672_p1) target bundleno = 1252 (0x4e4), region = 40 }
 0x4d8   : > { %v536_v26 = vpop.f32.mrf.mxu0 }
 0x4d9   : > { %v540_v27 = vadd.f32 %v536_v26, %v466_v25 }
 0x4da   : > { %v714_v28 = vpop.f32.mrf.mxu0 }
 0x4db   : > { %541 = vst.msk [vmem:[#allocation2] sm:$0xff] %vm227_vm2, %v540_v27 }
 0x4e2   : > { %v546_v29 = vld [vmem:[#allocation2] sm:$0xff] }
 0x4e3   : > { %547 = vst.msk [vmem:[%s201_s22] sm:$0xff] %vm227_vm2, %v546_v29 }
 0x4e4 PF: > { %s674_s29 = sshll.u32 %s875_s16, 7  ;;  %s562_s8 = sshll.u32 %s201_s22, 4  ;;  %s563_s8 = int_to_ptr.vmem [resolvable:$true] %s562_s8 }
 0x4e5   : > { %s560_s7 = scalar_lea.hbm %s1074_s3, %s674_s29  ;;  %s1081_s15 = sand.u32 1, %s863_s13  }
 0x4e6   : > { %s549_s9 = scalar_lea.sflag [#allocation4], %s1081_s15  ;;  %s795_s10 = scalar_lea.vmem %s563_s8, 128 }
 0x4e7   : > { %p796_p2 = scmp.ne.s32.totalorder %s563_s8, %s795_s10  ;;  %s894_s11 = smov [#allocation3]  }
 0x4e8   : > { %s799_s20 = sshll.u32 %s894_s11, 4  ;;  %s800_s20 = int_to_ptr.vmem [resolvable:$false] %s799_s20 }
 0x4e9   : > { %p797_p4 = pnand %p796_p2, %p964_p3  ;;  %s801_s21 = scalar_lea.vmem %s800_s20, 256 }
 0x4ea   : > { %p802_p6 = scmp.lt.s32.totalorder %s563_s8, %s800_s20  ;;  %p803_p7 = scmp.lt.s32.totalorder %s801_s21, %s795_s10 }
 0x4eb   : > { %p798_p5 = pneg %p797_p4 }
 0x4ec   : > { %p804_p8 = por %p803_p7, %p802_p6 }
 0x4ee   : > { %p805_p10 = pnand %p804_p8, %p798_p5 }
 0x4f0   : > { %808 = shalt.err (!%p805_p10)
}
 0x4f1   : > { %s809_s16 = scalar_lea.hbm %s560_s7, 128  ;;  %s813_s26 = scalar_lea.hbm %s1074_s3, 256 }
 0x4f2   : > { %p810_p11 = scmp.ne.s32.totalorder %s560_s7, %s809_s16  ;;  %p814_p0 = scmp.lt.s32.totalorder %s560_s7, %s1074_s3 }
 0x4f3   : > { %p815_p1 = scmp.lt.s32.totalorder %s813_s26, %s809_s16 }
 0x4f4   : > { %p811_p12 = pnand %p810_p11, %p964_p3 }
 0x4f5   : > { %p816_p2 = por %p815_p1, %p814_p0 }
 0x4f6   : > { %p812_p13 = pneg %p811_p12 }
 0x4f8   : > { %p817_p4 = pnand %p816_p2, %p812_p13 }
 0x4fa   : > { %820 = shalt.err (!%p817_p4)
}
 0x4fb   : > { %715 = dma.vmem_to_hbm [thread:$0]  (%p964_p3), %s563_s8, 128, %s560_s7, %s549_s9  }
 0x4fc PF: > { %p721_p5 = scmp.ge.s32.totalorder %s887_s19, 2  ;;  %s574_s4 = sand.u32 1, %s859_s12  }
 0x4fd   : > { %s575_s29 = scalar_lea.sflag [#allocation4], %s574_s4 }
 0x4fe   : > { %p718_p6 = pnand %p721_p5, %p974_p9 }
 0x500   : > { %p719_p7 = pneg %p718_p6 }
 0x502   : > { %854 = dma.done.wait (%p719_p7), %s575_s29, 128  }
 0x503   : > { %856 = vsyncadd (%p719_p7), %s575_s29, 4294967168  ;;  %s16_s19 = sadd.s32 1, %s887_s19   ;;  %s1082_s24 = sld [smem:[#allocation6_spill]] }
 0x504   : > { %p13_p8 = scmp.ge.s32.totalorder %s16_s19, 10   ;;  %s1083_s5 = sld [smem:[#allocation7_spill]] }
 0x505   : > { %s1084_s12 = smov %s863_s13  ;;  %s1085_s13 = smov %s867_s14 }
 0x506   : > { %s1086_s14 = smov %s982_s28  ;;  %s1087_s15 = smov %s879_s17 }
 0x507   : > { %s1088_s16 = smov %s883_s18  ;;  %15 = sbr.rel (!%p13_p8) target bundleno = 5 (0x5), region = 81 }
 0x509   : > { %s1089_s17 = smov %s1082_s24 }
 0x50a   : > { %s1090_s18 = smov %s1083_s5 }
 0x50c   :  { %580 = vsyncpa [#allocation4], 1 }
 0x50d   :  { %582 = vsyncpa [#allocation4 + $0x1], 1 }

</bundles_post_ra>
